<compile_context>
chip_gen: v6e
topology: v6e:2x2x1
jax: 0.10.0
libtpu: 0.0.40
codegen_flags: <defaults>
</compile_context>

<pallas_src>
import numpy as np
import jax
import jax.numpy as jnp
from jax.experimental import pallas as pl
from jax.experimental.pallas import tpu as pltpu


_LANE = 128
_MAX_COLS = 2048               # widest lane-dense slab width tried (multiple of 128)
_PALLAS_MIN_BYTES = 1 << 20    # below this, plain XLA multiply wins (launch overhead)
_MIN_GRID_STEPS = 8            # keep >= 8 grid steps (megacore + DMA overlap)


# ----------------------------- tiling selection ------------------------------

_TILING_CACHE = {}


def _tpu_vmem_capacity_bytes():
    """Per-core VMEM capacity, queried at trace time; conservative fallback."""
    try:
        return int(pltpu.get_tpu_info().vmem_capacity_bytes)
    except Exception:
        return 64 << 20        # v7x per-TC value: safe lower bound everywhere


def _pick_tiling():
    """(block_bytes, vmem_limit_bytes) sized per chip generation."""
    if "tiling" not in _TILING_CACHE:
        vmem = _tpu_vmem_capacity_bytes()           # 128 MiB v5e/v6e, 64 MiB v7x
        # 2 inputs + 2 outputs double-buffered = 4 blocks in flight; keep the
        # scoped-VMEM request comfortably under the smallest per-TC capacity.
        vmem_limit = min(3 * vmem // 4, 48 << 20)   # 48 MiB on current gens
        block_bytes = max(2 << 20, min(8 << 20, vmem_limit // 6))
        _TILING_CACHE["tiling"] = (block_bytes, vmem_limit)
    return _TILING_CACHE["tiling"]


# ------------------------------ Pallas kernel --------------------------------

def _neg_scale_kernel(coeff_ref, g_ref, o_ref):
    # grad_input = -coeff * grad_output ; coeff is a runtime f32 SMEM scalar.
    # Compute in f32 and cast the product so bf16/fp16 grads don't round the
    # coefficient itself (extra casts ride in idle VPU slots: kernel is
    # HBM-bandwidth bound).
    neg_c = -coeff_ref[0]
    o_ref[...] = (g_ref[...].astype(jnp.float32) * neg_c).astype(o_ref.dtype)


def _neg_scale(g, coeff):
    """Compute -coeff * g (shape/dtype preserved), Pallas-streamed when large."""
    shape, dtype = g.shape, g.dtype
    n = int(np.prod(shape)) if len(shape) else 1
    itemsize = g.dtype.itemsize
    neg_coeff = -jnp.asarray(coeff, dtype=jnp.float32)

    # Fallbacks (per review): tiny cotangents -> launch/per-step overhead
    # dominates and XLA fuses the multiply for free; ragged sizes
    # (n % 128 != 0) -> a padded copy would triple HBM traffic and defeat
    # the output alias, so use the fused XLA multiply there too.
    if n * itemsize < _PALLAS_MIN_BYTES or n % _LANE != 0:
        return (g.astype(jnp.float32) * neg_coeff).astype(dtype)

    # Lane-dense slab: widest power-of-two lane width (multiple of 128) that
    # divides n -> large unmasked vector stores / wide contiguous DMAs.
    cols = _MAX_COLS
    while cols > _LANE and n % cols:
        cols //= 2
    rows = n // cols
    g2d = g.reshape(rows, cols)

    block_bytes, vmem_limit = _pick_tiling()
    row_bytes = cols * itemsize
    block_rows = max(8, (block_bytes // row_bytes) // 8 * 8)
    # Guarantee >= _MIN_GRID_STEPS grid steps so both v7x TensorCores get work
    # and input/output DMAs of neighbouring steps overlap (never a 1-step grid).
    cap_rows = max(8, (rows // _MIN_GRID_STEPS) // 8 * 8)
    block_rows = min(block_rows, cap_rows)
    grid = (pl.cdiv(rows, block_rows),)

    coeff_smem = jnp.asarray(coeff, dtype=jnp.float32).reshape(1)

    out2d = pl.pallas_call(
        _neg_scale_kernel,
        out_shape=jax.ShapeDtypeStruct((rows, cols), dtype),
        grid_spec=pl.GridSpec(
            grid=grid,
            in_specs=[
                pl.BlockSpec(memory_space=pltpu.MemorySpace.SMEM),    # coeff
                pl.BlockSpec((block_rows, cols), lambda i: (i, 0)),   # grad tile
            ],
            out_specs=pl.BlockSpec((block_rows, cols), lambda i: (i, 0)),
        ),
        compiler_params=pltpu.CompilerParams(
            dimension_semantics=("parallel",),
            vmem_limit_bytes=vmem_limit),
        input_output_aliases={1: 0},   # reuse the cotangent's HBM buffer
    )(coeff_smem, g2d)

    return out2d.reshape(shape)


# ------------------- gradient-reverse function (custom_vjp) ------------------

@jax.custom_vjp
def _gradient_reverse(x, coeff):
    del coeff            # forward is identity; coeff only matters in backward
    return x


def _grl_fwd(x, coeff):
    return x, coeff


def _grl_bwd(coeff, g):
    # grad wrt x is reversed/scaled; coeff gets a zero cotangent (PyTorch: None).
    return _neg_scale(g, coeff), jnp.zeros((), dtype=jnp.float32)


_gradient_reverse.defvjp(_grl_fwd, _grl_bwd)


def gradient_reverse(x, coeff=1.0):
    """Identity in forward; grad_input = -coeff * grad_output in backward."""
    return _gradient_reverse(x, jnp.asarray(coeff, dtype=jnp.float32))


# ----------------------------- module equivalent -----------------------------

class WarmStartGradientReverseLayer:
    """JAX/Pallas port of the PyTorch WarmStartGradientReverseLayer."""

    def __init__(self, alpha=1.0, lo=0.0, hi=1.0, max_iters=1000.0,
                 auto_step=False):
        self.alpha = alpha
        self.lo = lo
        self.hi = hi
        self.iter_num = 0
        self.max_iters = max_iters
        self.auto_step = auto_step

    def coeff(self):
        # Warm-start sigmoid schedule lo -> hi over max_iters.
        # Canonical WarmStartGradientReverseLayer formula ('1.0 +' in the
        # denominator, per prior review); at iter_num=0 coeff == lo.
        return float(np.float32(
            2.0 * (self.hi - self.lo)
            / (1.0 + np.exp(-self.alpha * self.iter_num / self.max_iters))
            - (self.hi - self.lo) + self.lo))

    def __call__(self, x):
        c = self.coeff()
        if self.auto_step:
            self.step()
        return gradient_reverse(x, c)

    def step(self):
        self.iter_num += 1


# ----------------------------------- main ------------------------------------

if __name__ == "__main__":
    key = jax.random.PRNGKey(0)
    k1, k2 = jax.random.split(key)

    # Small module-shaped input (NCHW), as in typical usage of the layer.
    x = jax.random.normal(k1, (2, 4, 16, 16), dtype=jnp.float32)

    grl = WarmStartGradientReverseLayer(alpha=1.0, lo=0.0, hi=1.0,
                                        max_iters=1000.0, auto_step=True)

    # Forward pass: identity (no kernel, no extra HBM traffic).
    y = jax.block_until_ready(grl(x))
    assert y.shape == x.shape and y.dtype == x.dtype
    np.testing.assert_allclose(np.asarray(y), np.asarray(x), rtol=0, atol=0)

    # Backward on the small tensor (exercises the fused-XLA small-size path).
    grl2 = WarmStartGradientReverseLayer(auto_step=False)
    for _ in range(100):     # advance the warm-start so coeff > 0
        grl2.step()
    c = grl2.coeff()
    g_small = jax.block_until_ready(
        jax.grad(lambda t: jnp.sum(gradient_reverse(t, c)))(x))
    np.testing.assert_allclose(
        np.asarray(g_small),
        -np.float32(c) * np.ones(x.shape, dtype=np.float32),
        rtol=1e-6, atol=1e-6)

    # Larger cotangent (4 MiB f32) -> exercises the Pallas neg-scale kernel.
    xb = jax.random.normal(k2, (4, 8, 128, 256), dtype=jnp.float32)
    g_big = jax.block_until_ready(
        jax.grad(lambda t: jnp.sum(gradient_reverse(t, c)))(xb))
    np.testing.assert_allclose(
        np.asarray(g_big),
        -np.float32(c) * np.ones(xb.shape, dtype=np.float32),
        rtol=1e-6, atol=1e-6)

    # bf16 cotangent through the Pallas path (f32 compute, bf16 IO).
    xb16 = xb.astype(jnp.bfloat16)
    g_b16 = jax.block_until_ready(
        jax.grad(lambda t: jnp.sum(gradient_reverse(t, c)))(xb16))
    np.testing.assert_allclose(
        np.asarray(g_b16.astype(jnp.float32)),
        -np.float32(c) * np.ones(xb.shape, dtype=np.float32),
        rtol=0, atol=1e-2)

    print("KERNEL_OK")
</pallas_src>

<mosaic_0001>
module attributes {stable_mosaic.version = 11 : i64} {
  func.func @_neg_scale_kernel(%arg0: i32, %arg1: memref<1xf32, #tpu.memory_space<smem>>, %arg2: memref<64x2048xf32, #tpu.memory_space<vmem>>, %arg3: memref<64x2048xf32, #tpu.memory_space<vmem>>) attributes {dimension_semantics = [#tpu.dimension_semantics<parallel>], iteration_bounds = array<i64: 8>, scalar_prefetch = 0 : i64, scratch_operands = 0 : i64, tpu.core_type = #tpu.core_type<tc>, window_params = [{transform_indices = @transform_0, window_bounds = array<i64: 1>}, {transform_indices = @transform_1, window_bounds = array<i64: 64, 2048>}, {transform_indices = @transform_2, window_bounds = array<i64: 64, 2048>}]} {
    %c0 = arith.constant 0 : index
    %0 = memref.load %arg1[%c0] : memref<1xf32, #tpu.memory_space<smem>>
    %cst = arith.constant 0.000000e+00 : f32
    %1 = arith.subf %cst, %0 : f32
    %c0_0 = arith.constant 0 : index
    %c0_1 = arith.constant 0 : index
    %2 = vector.load %arg2[%c0_0, %c0_1] : memref<64x2048xf32, #tpu.memory_space<vmem>>, vector<64x2048xf32>
    %3 = vector.broadcast %1 : f32 to vector<64x2048xf32>
    %4 = arith.mulf %2, %3 : vector<64x2048xf32>
    %c0_2 = arith.constant 0 : index
    %c0_3 = arith.constant 0 : index
    %5 = vector.load %arg3[%c0_2, %c0_3] : memref<64x2048xf32, #tpu.memory_space<vmem>>, vector<64x2048xf32>
    tpu.vector_store %arg3[%c0_2, %c0_3], %4 {strides = array<i32>} : memref<64x2048xf32, #tpu.memory_space<vmem>>, vector<64x2048xf32>,
    return
  }
  func.func @transform_0(%arg0: i32) -> i32 {
    %c0_i32 = arith.constant 0 : i32
    %c0_i32_0 = arith.constant 0 : i32
    return %c0_i32 : i32
  }
  func.func @transform_1(%arg0: i32) -> (i32, i32) {
    %c0_i32 = arith.constant 0 : i32
    %c0_i32_0 = arith.constant 0 : i32
    return %arg0, %c0_i32 : i32, i32
  }
  func.func @transform_2(%arg0: i32) -> (i32, i32) {
    %c0_i32 = arith.constant 0 : i32
    %c0_i32_0 = arith.constant 0 : i32
    return %arg0, %c0_i32 : i32, i32
  }
}

</mosaic_0001>

<bundles_post_ra>
// kernel: tpu_custom_call.1
= control target key start
LH: loop header
LB: loop body
LE: loop exit
PB: predicated region body
PF: predicated region fallthrough
CT: control target
= control target key end

     0   :  { %s1376_s0 = inlined_call_operand.<no memory space> [shape: f32[1], index: 0, kind: input, shape index: {}]   ;;  %s1377_s1 = inlined_call_operand.hbm [shape: f32[512,2048], index: 1, kind: input, shape index: {}, may-alias: {1,2}]   ;;  %s1378_s2 = inlined_call_operand.hbm [shape: f32[512,2048], index: 2, kind: output, shape index: {}, may-alias: {1,2}]  }
   0x1   :  { %7 = sst [smem:[#allocation2]] %s1376_s0 }
   0x2   :  { %8 = vsyncpa [#allocation4], 0 }
   0x3   :  { %10 = vsyncpa [#allocation4 + $0x1], 0 }
   0x4   :  { %11 = vsyncpa [#allocation5], 0 }
   0x5   :  { %13 = vsyncpa [#allocation5 + $0x1], 0  ;;  %s829_s11 = smov 0   ;;  %s831_s12 = smov 0  }
   0x6   :  { %s833_s13 = smov 0   ;;  %s835_s14 = smov 0  }
   0x7 LB: > { %s850_s0 = sadd.s32 4294967295, %s803_s14   ;;  %s641_s15 = sadd.s32 4294967294, %s803_s14   ;;  %s803_s14 = sphi %s835_s14, %s1392_s14   ;;  %s799_s13 = sphi %s833_s13, %s1391_s13   ;;  %s795_s12 = sphi %s831_s12, %s1390_s12   ;;  %s791_s11 = sphi %s829_s11, %s1389_s11  }
   0x8   : > { %s854_s16 = sadd.s32 1, %s803_s14   ;;  %s47_s17 = sadd.s32 1, %s799_s13 }
   0x9   : > { %s44_s18 = ssub.s32 %s803_s14, %s854_s16  ;;  %p54_p0 = scmp.ne.s32.totalorder %s799_s13, %s795_s12 }
   0xa   : > { %p45_p1 = scmp.eq.s32.totalorder %s44_s18, 0  ;;  %p55_p2 = scmp.eq.s32.totalorder %s803_s14, 0 }
   0xb   : > { %p60_p3 = scmp.ne.s32.totalorder %s795_s12, %s791_s11  ;;  %p61_p4 = scmp.eq.s32.totalorder %s850_s0, 0 }
   0xc   : > { %s866_s19 = scalar_select %p45_p1, %s799_s13, %s47_s17  }
   0xd   : > { %p868_p5 = por %p55_p2, %p54_p0  ;;  %p872_p6 = por %p61_p4, %p60_p3 }
   0xe   : > { %p84_p7 = scmp.eq.s32.totalorder %s850_s0, 7  ;;  %p90_p8 = scmp.eq.s32.totalorder %s641_s15, 7 }
   0xf   : > { %s1382_s21 = scalar_select %p872_p6, 1, 0 }
  0x10   : > { %p673_p9 = scmp.lt.s32.totalorder %s803_s14, 8  ;;  %p878_p10 = por %p84_p7, %p54_p0 }
  0x11   : > { %p882_p11 = por %p90_p8, %p60_p3  ;;  %s113_s24 = sand.u32 1, %s799_s13  }
  0x12   : > { %s1383_s22 = scalar_select %p878_p10, 1, 0 }
  0x13   : > { %s1384_s23 = scalar_select %p882_p11, 1, 0 }
  0x14   : > { %s658_s25 = sshll.u32 %s803_s14, 14  ;;  %s644_s26 = sshll.u32 %s113_s24, 10 }
  0x15   : > { %s891_s29 = scalar_lea.hbm %s1377_s1, %s658_s25  ;;  %s117_s30 = scalar_lea.vmem [#allocation3], %s644_s26 }
  0x16   : > { %s125_s3 = sshll.u32 %s117_s30, 4  ;;  %p895_p12 = pnand %p673_p9, %p868_p5  ;;  %s899_s3 = int_to_ptr.vmem [resolvable:$true] %s125_s3 }
  0x17   : > { %s901_s5 = scalar_lea.sflag [#allocation4], %s113_s24  ;;  %s711_s6 = scalar_lea.hbm %s891_s29, 16384 }
  0x18   : > { %p712_p13 = scmp.ne.s32.totalorder %s891_s29, %s711_s6  ;;  %p713_p0 = pneg %p895_p12 }
  0x19   : > { %s716_s9 = scalar_lea.hbm %s1377_s1, 131072  ;;  %p717_p3 = scmp.lt.s32.totalorder %s891_s29, %s1377_s1 }
  0x1a   : > { %p714_p1 = pnand %p713_p0, %p712_p13  ;;  %p718_p4 = scmp.lt.s32.totalorder %s716_s9, %s711_s6 }
  0x1c   : > { %p715_p2 = pneg %p714_p1  ;;  %p719_p5 = por %p718_p4, %p717_p3 }
  0x1e   : > { %p720_p7 = pnand %p719_p5, %p715_p2 }
  0x20   : > { %723 = shalt.err (!%p720_p7)
}
  0x21   : > { %s724_s17 = scalar_lea.vmem %s899_s3, 16384  ;;  %s805_s18 = smov [#allocation3]  }
  0x22   : > { %p725_p8 = scmp.ne.s32.totalorder %s899_s3, %s724_s17  ;;  %s729_s20 = sshll.u32 %s805_s18, 4  ;;  %s730_s20 = int_to_ptr.vmem [resolvable:$false] %s729_s20 }
  0x23   : > { %s731_s24 = scalar_lea.vmem %s730_s20, 32768  ;;  %p732_p1 = scmp.lt.s32.totalorder %s899_s3, %s730_s20 }
  0x24   : > { %p727_p9 = pnand %p725_p8, %p713_p0  ;;  %p733_p11 = scmp.lt.s32.totalorder %s731_s24, %s724_s17 }
  0x26   : > { %p728_p13 = pneg %p727_p9  ;;  %p734_p10 = por %p733_p11, %p732_p1 }
  0x28   : > { %p735_p6 = pnand %p734_p10, %p728_p13 }
  0x2a   : > { %738 = shalt.err (!%p735_p6)
}
  0x2b   : > { %s806_s25 = smov 2048   ;;  %s807_s26 = smov 128  }
  0x2c   : > { %668 = dma.hbm_to_vmem [thread:$0]  (!%p895_p12), %s891_s29, 16384, %s899_s3, %s901_s5, %s806_s25, %s806_s25, %s807_s26  }
  0x2d   : > { %p648_p0 = scmp.ge.s32.totalorder %s803_s14, 1  ;;  %p133_p2 = scmp.lt.s32.totalorder %s803_s14, 9 }
  0x2f   : > { %p134_p3 = pnand %p648_p0, %p133_p2 }
  0x30   : > { %s925_s27 = sand.u32 (!%p134_p3), 1, %s795_s12   ;;  %p1386_p6 = scmp.ne.s32.totalorder (!%p134_p3), %s1382_s21, 0 }
  0x31   : > { %137 = sbr.rel (%p134_p3) target bundleno = 143 (0x8f), region = 28  ;;  %s649_s28 = sshll.u32 (!%p134_p3), %s925_s27, 10 }
  0x32   : > { %s140_s30 = scalar_lea.sflag (!%p134_p3), [#allocation4], %s925_s27  ;;  %s931_s6 = scalar_lea.vmem (!%p134_p3), [#allocation3], %s649_s28 }
  0x36   : > { %782 = dma.done.wait (%p1386_p6), %s140_s30, 16384  }
  0x37   : > { %784 = vsyncadd (%p1386_p6), %s140_s30, 4294950912  ;;  %s166_s29 = sld [smem:[#allocation2]]  ;;  %v168_v0 = vld [vmem:[%s931_s6] sm:$0xff]  ;;  %v169_v1 = vld [vmem:[%s931_s6 + $0x8] sm:$0xff]  ;;  %s964_s21 = scalar_lea.vmem [#allocation6], %s649_s28 }
  0x38   : > { %v170_v2 = vld [vmem:[%s931_s6 + $0x10] sm:$0xff]  ;;  %v171_v3 = vld [vmem:[%s931_s6 + $0x18] sm:$0xff]  ;;  %v172_v4 = vld [vmem:[%s931_s6 + $0x20] sm:$0xff]  ;;  %s660_s4 = sshll.u32 %s850_s0, 14  ;;  %s568_s5 = sshll.u32 %s964_s21, 4  ;;  %s1324_s5 = int_to_ptr.vmem [resolvable:$true] %s568_s5 }
  0x39   : > { %v173_v5 = vld [vmem:[%s931_s6 + $0x28] sm:$0xff]  ;;  %v174_v7 = vld [vmem:[%s931_s6 + $0x30] sm:$0xff]  ;;  %v175_v8 = vld [vmem:[%s931_s6 + $0x38] sm:$0xff]  ;;  %s1322_s8 = scalar_lea.hbm %s1378_s2, %s660_s4  ;;  %s554_s9 = scalar_lea.sflag [#allocation5], %s925_s27 }
  0x3a   : > { %v176_v9 = vld [vmem:[%s931_s6 + $0x40] sm:$0xff]  ;;  %v177_v14 = vld [vmem:[%s931_s6 + $0x48] sm:$0xff]  ;;  %v178_v15 = vld [vmem:[%s931_s6 + $0x50] sm:$0xff]  ;;  %s739_s10 = scalar_lea.vmem %s1324_s5, 16384  ;;  %p1387_p11 = scmp.ne.s32.totalorder %s1383_s22, 0 }
  0x3b   : > { %v179_v16 = vld [vmem:[%s931_s6 + $0x58] sm:$0xff]  ;;  %v180_v21 = vld [vmem:[%s931_s6 + $0x60] sm:$0xff]  ;;  %v181_v22 = vld [vmem:[%s931_s6 + $0x68] sm:$0xff]  ;;  %p740_p10 = scmp.ne.s32.totalorder %s1324_s5, %s739_s10  ;;  %s808_s15 = smov [#allocation6]  }
  0x3c   : > { %v182_v23 = vld [vmem:[%s931_s6 + $0x70] sm:$0xff]  ;;  %v183_v28 = vld [vmem:[%s931_s6 + $0x78] sm:$0xff]  ;;  %v184_v29 = vld [vmem:[%s931_s6 + $0x80] sm:$0xff]  ;;  %s743_s17 = sshll.u32 %s808_s15, 4  ;;  %s744_s17 = int_to_ptr.vmem [resolvable:$false] %s743_s17 }
  0x3d   : > { %s167_s3 = ssub.f32 0.0, %s166_s29  ;;  %v185_v30 = vld [vmem:[%s931_s6 + $0x88] sm:$0xff]  ;;  %v186_v35 = vld [vmem:[%s931_s6 + $0x90] sm:$0xff]  ;;  %v187_v36 = vld [vmem:[%s931_s6 + $0x98] sm:$0xff]  ;;  %p741_p12 = pnand %p740_p10, %p1387_p11 }
  0x3e   : > { %v188_v37 = vld [vmem:[%s931_s6 + $0xa0] sm:$0xff]  ;;  %v189_v42 = vld [vmem:[%s931_s6 + $0xa8] sm:$0xff]  ;;  %v190_v43 = vld [vmem:[%s931_s6 + $0xb0] sm:$0xff]  ;;  %s745_s18 = scalar_lea.vmem %s744_s17, 32768  ;;  %p746_p5 = scmp.lt.s32.totalorder %s1324_s5, %s744_s17 }
  0x3f   : > { %v943_v6 = vstv %s167_s3  ;;  %v191_v44 = vld [vmem:[%s931_s6 + $0xb8] sm:$0xff]  ;;  %v192_v49 = vld [vmem:[%s931_s6 + $0xc0] sm:$0xff]  ;;  %v193_v50 = vld [vmem:[%s931_s6 + $0xc8] sm:$0xff]  ;;  %p742_p4 = pneg %p741_p12  ;;  %p747_p7 = scmp.lt.s32.totalorder %s745_s18, %s739_s10 }
  0x40   : > { %v297_v10 = vmul.f32 %v943_v6, %v168_v0  ;;  %v298_v11 = vmul.f32 %v943_v6, %v169_v1  ;;  %v299_v12 = vmul.f32 %v943_v6, %v170_v2  ;;  %v300_v13 = vmul.f32 %v943_v6, %v171_v3  ;;  %v194_v51 = vld [vmem:[%s931_s6 + $0xd0] sm:$0xff]  ;;  %v195_v55 = vld [vmem:[%s931_s6 + $0xd8] sm:$0xff]  ;;  %v196_v56 = vld [vmem:[%s931_s6 + $0xe0] sm:$0xff] }
  0x41   : > { %v301_v17 = vmul.f32 %v943_v6, %v172_v4  ;;  %v302_v18 = vmul.f32 %v943_v6, %v173_v5  ;;  %v303_v19 = vmul.f32 %v943_v6, %v174_v7  ;;  %v304_v20 = vmul.f32 %v943_v6, %v175_v8  ;;  %v197_v57 = vld [vmem:[%s931_s6 + $0xe8] sm:$0xff]  ;;  %v198_v61 = vld [vmem:[%s931_s6 + $0xf0] sm:$0xff]  ;;  %v199_v62 = vld [vmem:[%s931_s6 + $0xf8] sm:$0xff]  ;;  %p748_p8 = por %p747_p7, %p746_p5 }
  0x42   : > { %425 = vst [vmem:[%s964_s21] sm:$0xff] %v297_v10  ;;  %426 = vst [vmem:[%s964_s21 + $0x8] sm:$0xff] %v298_v11  ;;  %v305_v24 = vmul.f32 %v943_v6, %v176_v9  ;;  %v306_v25 = vmul.f32 %v943_v6, %v177_v14  ;;  %v307_v26 = vmul.f32 %v943_v6, %v178_v15  ;;  %v200_v63 = vld [vmem:[%s931_s6 + $0x100] sm:$0xff]  ;;  %v201_v3 = vld [vmem:[%s931_s6 + $0x108] sm:$0xff] }
  0x43   : > { %427 = vst [vmem:[%s964_s21 + $0x10] sm:$0xff] %v299_v12  ;;  %428 = vst [vmem:[%s964_s21 + $0x18] sm:$0xff] %v300_v13  ;;  %v308_v27 = vmul.f32 %v943_v6, %v179_v16  ;;  %v309_v31 = vmul.f32 %v943_v6, %v180_v21  ;;  %v310_v32 = vmul.f32 %v943_v6, %v181_v22  ;;  %v202_v4 = vld [vmem:[%s931_s6 + $0x110] sm:$0xff]  ;;  %v203_v5 = vld [vmem:[%s931_s6 + $0x118] sm:$0xff]  ;;  %p749_p9 = pnand %p748_p8, %p742_p4 }
  0x44   : > { %429 = vst [vmem:[%s964_s21 + $0x20] sm:$0xff] %v301_v17  ;;  %430 = vst [vmem:[%s964_s21 + $0x28] sm:$0xff] %v302_v18  ;;  %v311_v33 = vmul.f32 %v943_v6, %v182_v23  ;;  %v312_v34 = vmul.f32 %v943_v6, %v183_v28  ;;  %v313_v38 = vmul.f32 %v943_v6, %v184_v29  ;;  %v204_v10 = vld [vmem:[%s931_s6 + $0x120] sm:$0xff]  ;;  %v205_v11 = vld [vmem:[%s931_s6 + $0x128] sm:$0xff] }
  0x45   : > { %431 = vst [vmem:[%s964_s21 + $0x30] sm:$0xff] %v303_v19  ;;  %432 = vst [vmem:[%s964_s21 + $0x38] sm:$0xff] %v304_v20  ;;  %v314_v39 = vmul.f32 %v943_v6, %v185_v30  ;;  %v315_v40 = vmul.f32 %v943_v6, %v186_v35  ;;  %v316_v41 = vmul.f32 %v943_v6, %v187_v36  ;;  %v206_v12 = vld [vmem:[%s931_s6 + $0x130] sm:$0xff]  ;;  %v207_v16 = vld [vmem:[%s931_s6 + $0x138] sm:$0xff] }
  0x46   : > { %433 = vst [vmem:[%s964_s21 + $0x40] sm:$0xff] %v305_v24  ;;  %434 = vst [vmem:[%s964_s21 + $0x48] sm:$0xff] %v306_v25  ;;  %v317_v45 = vmul.f32 %v943_v6, %v188_v37  ;;  %v318_v46 = vmul.f32 %v943_v6, %v189_v42  ;;  %v319_v47 = vmul.f32 %v943_v6, %v190_v43  ;;  %v208_v17 = vld [vmem:[%s931_s6 + $0x140] sm:$0xff]  ;;  %v209_v18 = vld [vmem:[%s931_s6 + $0x148] sm:$0xff] }
  0x47   : > { %435 = vst [vmem:[%s964_s21 + $0x50] sm:$0xff] %v307_v26  ;;  %436 = vst [vmem:[%s964_s21 + $0x58] sm:$0xff] %v308_v27  ;;  %v320_v48 = vmul.f32 %v943_v6, %v191_v44  ;;  %v321_v52 = vmul.f32 %v943_v6, %v192_v49  ;;  %v322_v53 = vmul.f32 %v943_v6, %v193_v50  ;;  %v210_v22 = vld [vmem:[%s931_s6 + $0x150] sm:$0xff]  ;;  %v211_v23 = vld [vmem:[%s931_s6 + $0x158] sm:$0xff] }
  0x48   : > { %437 = vst [vmem:[%s964_s21 + $0x60] sm:$0xff] %v309_v31  ;;  %438 = vst [vmem:[%s964_s21 + $0x68] sm:$0xff] %v310_v32  ;;  %v323_v54 = vmul.f32 %v943_v6, %v194_v51  ;;  %v324_v58 = vmul.f32 %v943_v6, %v195_v55  ;;  %v325_v59 = vmul.f32 %v943_v6, %v196_v56  ;;  %v212_v24 = vld [vmem:[%s931_s6 + $0x160] sm:$0xff]  ;;  %v213_v28 = vld [vmem:[%s931_s6 + $0x168] sm:$0xff] }
  0x49   : > { %439 = vst [vmem:[%s964_s21 + $0x70] sm:$0xff] %v311_v33  ;;  %440 = vst [vmem:[%s964_s21 + $0x78] sm:$0xff] %v312_v34  ;;  %v326_v60 = vmul.f32 %v943_v6, %v197_v57  ;;  %v327_v0 = vmul.f32 %v943_v6, %v198_v61  ;;  %v328_v1 = vmul.f32 %v943_v6, %v199_v62  ;;  %v214_v29 = vld [vmem:[%s931_s6 + $0x170] sm:$0xff]  ;;  %v215_v30 = vld [vmem:[%s931_s6 + $0x178] sm:$0xff] }
  0x4a   : > { %441 = vst [vmem:[%s964_s21 + $0x80] sm:$0xff] %v313_v38  ;;  %442 = vst [vmem:[%s964_s21 + $0x88] sm:$0xff] %v314_v39  ;;  %v329_v2 = vmul.f32 %v943_v6, %v200_v63  ;;  %v330_v7 = vmul.f32 %v943_v6, %v201_v3  ;;  %v331_v8 = vmul.f32 %v943_v6, %v202_v4  ;;  %v216_v34 = vld [vmem:[%s931_s6 + $0x180] sm:$0xff]  ;;  %v217_v35 = vld [vmem:[%s931_s6 + $0x188] sm:$0xff] }
  0x4b   : > { %443 = vst [vmem:[%s964_s21 + $0x90] sm:$0xff] %v315_v40  ;;  %444 = vst [vmem:[%s964_s21 + $0x98] sm:$0xff] %v316_v41  ;;  %v332_v9 = vmul.f32 %v943_v6, %v203_v5  ;;  %v333_v13 = vmul.f32 %v943_v6, %v204_v10  ;;  %v334_v14 = vmul.f32 %v943_v6, %v205_v11  ;;  %v218_v36 = vld [vmem:[%s931_s6 + $0x190] sm:$0xff]  ;;  %v219_v40 = vld [vmem:[%s931_s6 + $0x198] sm:$0xff] }
  0x4c   : > { %445 = vst [vmem:[%s964_s21 + $0xa0] sm:$0xff] %v317_v45  ;;  %446 = vst [vmem:[%s964_s21 + $0xa8] sm:$0xff] %v318_v46  ;;  %v335_v15 = vmul.f32 %v943_v6, %v206_v12  ;;  %v336_v19 = vmul.f32 %v943_v6, %v207_v16  ;;  %v337_v20 = vmul.f32 %v943_v6, %v208_v17  ;;  %v220_v41 = vld [vmem:[%s931_s6 + $0x1a0] sm:$0xff]  ;;  %v221_v42 = vld [vmem:[%s931_s6 + $0x1a8] sm:$0xff] }
  0x4d   : > { %447 = vst [vmem:[%s964_s21 + $0xb0] sm:$0xff] %v319_v47  ;;  %448 = vst [vmem:[%s964_s21 + $0xb8] sm:$0xff] %v320_v48  ;;  %v338_v21 = vmul.f32 %v943_v6, %v209_v18  ;;  %v339_v25 = vmul.f32 %v943_v6, %v210_v22  ;;  %v340_v26 = vmul.f32 %v943_v6, %v211_v23  ;;  %v222_v46 = vld [vmem:[%s931_s6 + $0x1b0] sm:$0xff]  ;;  %v223_v47 = vld [vmem:[%s931_s6 + $0x1b8] sm:$0xff] }
  0x4e   : > { %449 = vst [vmem:[%s964_s21 + $0xc0] sm:$0xff] %v321_v52  ;;  %450 = vst [vmem:[%s964_s21 + $0xc8] sm:$0xff] %v322_v53  ;;  %v341_v27 = vmul.f32 %v943_v6, %v212_v24  ;;  %v342_v31 = vmul.f32 %v943_v6, %v213_v28  ;;  %v343_v32 = vmul.f32 %v943_v6, %v214_v29  ;;  %v224_v48 = vld [vmem:[%s931_s6 + $0x1c0] sm:$0xff]  ;;  %v225_v52 = vld [vmem:[%s931_s6 + $0x1c8] sm:$0xff] }
  0x4f   : > { %451 = vst [vmem:[%s964_s21 + $0xd0] sm:$0xff] %v323_v54  ;;  %452 = vst [vmem:[%s964_s21 + $0xd8] sm:$0xff] %v324_v58  ;;  %v344_v33 = vmul.f32 %v943_v6, %v215_v30  ;;  %v345_v37 = vmul.f32 %v943_v6, %v216_v34  ;;  %v346_v38 = vmul.f32 %v943_v6, %v217_v35  ;;  %v226_v53 = vld [vmem:[%s931_s6 + $0x1d0] sm:$0xff]  ;;  %v227_v54 = vld [vmem:[%s931_s6 + $0x1d8] sm:$0xff] }
  0x50   : > { %453 = vst [vmem:[%s964_s21 + $0xe0] sm:$0xff] %v325_v59  ;;  %454 = vst [vmem:[%s964_s21 + $0xe8] sm:$0xff] %v326_v60  ;;  %v347_v39 = vmul.f32 %v943_v6, %v218_v36  ;;  %v348_v43 = vmul.f32 %v943_v6, %v219_v40  ;;  %v349_v44 = vmul.f32 %v943_v6, %v220_v41  ;;  %v228_v58 = vld [vmem:[%s931_s6 + $0x1e0] sm:$0xff]  ;;  %v229_v59 = vld [vmem:[%s931_s6 + $0x1e8] sm:$0xff] }
  0x51   : > { %455 = vst [vmem:[%s964_s21 + $0xf0] sm:$0xff] %v327_v0  ;;  %456 = vst [vmem:[%s964_s21 + $0xf8] sm:$0xff] %v328_v1  ;;  %v350_v45 = vmul.f32 %v943_v6, %v221_v42  ;;  %v351_v49 = vmul.f32 %v943_v6, %v222_v46  ;;  %v352_v50 = vmul.f32 %v943_v6, %v223_v47  ;;  %v230_v60 = vld [vmem:[%s931_s6 + $0x1f0] sm:$0xff]  ;;  %v231_v0 = vld [vmem:[%s931_s6 + $0x1f8] sm:$0xff] }
  0x52   : > { %457 = vst [vmem:[%s964_s21 + $0x100] sm:$0xff] %v329_v2  ;;  %458 = vst [vmem:[%s964_s21 + $0x108] sm:$0xff] %v330_v7  ;;  %v353_v51 = vmul.f32 %v943_v6, %v224_v48  ;;  %v354_v55 = vmul.f32 %v943_v6, %v225_v52  ;;  %v355_v56 = vmul.f32 %v943_v6, %v226_v53  ;;  %v232_v1 = vld [vmem:[%s931_s6 + $0x200] sm:$0xff]  ;;  %v233_v2 = vld [vmem:[%s931_s6 + $0x208] sm:$0xff] }
  0x53   : > { %459 = vst [vmem:[%s964_s21 + $0x110] sm:$0xff] %v331_v8  ;;  %460 = vst [vmem:[%s964_s21 + $0x118] sm:$0xff] %v332_v9  ;;  %v356_v57 = vmul.f32 %v943_v6, %v227_v54  ;;  %v357_v61 = vmul.f32 %v943_v6, %v228_v58  ;;  %v358_v62 = vmul.f32 %v943_v6, %v229_v59  ;;  %v234_v7 = vld [vmem:[%s931_s6 + $0x210] sm:$0xff]  ;;  %v235_v8 = vld [vmem:[%s931_s6 + $0x218] sm:$0xff] }
  0x54   : > { %461 = vst [vmem:[%s964_s21 + $0x120] sm:$0xff] %v333_v13  ;;  %462 = vst [vmem:[%s964_s21 + $0x128] sm:$0xff] %v334_v14  ;;  %v359_v63 = vmul.f32 %v943_v6, %v230_v60  ;;  %v360_v3 = vmul.f32 %v943_v6, %v231_v0  ;;  %v361_v4 = vmul.f32 %v943_v6, %v232_v1  ;;  %v236_v9 = vld [vmem:[%s931_s6 + $0x220] sm:$0xff]  ;;  %v237_v13 = vld [vmem:[%s931_s6 + $0x228] sm:$0xff] }
  0x55   : > { %463 = vst [vmem:[%s964_s21 + $0x130] sm:$0xff] %v335_v15  ;;  %464 = vst [vmem:[%s964_s21 + $0x138] sm:$0xff] %v336_v19  ;;  %v362_v5 = vmul.f32 %v943_v6, %v233_v2  ;;  %v363_v10 = vmul.f32 %v943_v6, %v234_v7  ;;  %v364_v11 = vmul.f32 %v943_v6, %v235_v8  ;;  %v238_v14 = vld [vmem:[%s931_s6 + $0x230] sm:$0xff]  ;;  %v239_v15 = vld [vmem:[%s931_s6 + $0x238] sm:$0xff] }
  0x56   : > { %465 = vst [vmem:[%s964_s21 + $0x140] sm:$0xff] %v337_v20  ;;  %466 = vst [vmem:[%s964_s21 + $0x148] sm:$0xff] %v338_v21  ;;  %v365_v12 = vmul.f32 %v943_v6, %v236_v9  ;;  %v366_v16 = vmul.f32 %v943_v6, %v237_v13  ;;  %v367_v17 = vmul.f32 %v943_v6, %v238_v14  ;;  %v240_v19 = vld [vmem:[%s931_s6 + $0x240] sm:$0xff]  ;;  %v241_v20 = vld [vmem:[%s931_s6 + $0x248] sm:$0xff] }
  0x57   : > { %467 = vst [vmem:[%s964_s21 + $0x150] sm:$0xff] %v339_v25  ;;  %468 = vst [vmem:[%s964_s21 + $0x158] sm:$0xff] %v340_v26  ;;  %v368_v18 = vmul.f32 %v943_v6, %v239_v15  ;;  %v242_v21 = vld [vmem:[%s931_s6 + $0x250] sm:$0xff]  ;;  %v369_v22 = vmul.f32 %v943_v6, %v240_v19  ;;  %v370_v23 = vmul.f32 %v943_v6, %v241_v20  ;;  %v243_v25 = vld [vmem:[%s931_s6 + $0x258] sm:$0xff] }
  0x58   : > { %469 = vst [vmem:[%s964_s21 + $0x160] sm:$0xff] %v341_v27  ;;  %470 = vst [vmem:[%s964_s21 + $0x168] sm:$0xff] %v342_v31  ;;  %v371_v24 = vmul.f32 %v943_v6, %v242_v21  ;;  %v244_v26 = vld [vmem:[%s931_s6 + $0x260] sm:$0xff]  ;;  %v245_v27 = vld [vmem:[%s931_s6 + $0x268] sm:$0xff]  ;;  %v372_v28 = vmul.f32 %v943_v6, %v243_v25 }
  0x59   : > { %471 = vst [vmem:[%s964_s21 + $0x170] sm:$0xff] %v343_v32  ;;  %472 = vst [vmem:[%s964_s21 + $0x178] sm:$0xff] %v344_v33  ;;  %v373_v29 = vmul.f32 %v943_v6, %v244_v26  ;;  %v374_v30 = vmul.f32 %v943_v6, %v245_v27  ;;  %v246_v31 = vld [vmem:[%s931_s6 + $0x270] sm:$0xff]  ;;  %v247_v32 = vld [vmem:[%s931_s6 + $0x278] sm:$0xff] }
  0x5a   : > { %473 = vst [vmem:[%s964_s21 + $0x180] sm:$0xff] %v345_v37  ;;  %474 = vst [vmem:[%s964_s21 + $0x188] sm:$0xff] %v346_v38  ;;  %v248_v33 = vld [vmem:[%s931_s6 + $0x280] sm:$0xff]  ;;  %v375_v34 = vmul.f32 %v943_v6, %v246_v31  ;;  %v376_v35 = vmul.f32 %v943_v6, %v247_v32  ;;  %v249_v37 = vld [vmem:[%s931_s6 + $0x288] sm:$0xff] }
  0x5b   : > { %475 = vst [vmem:[%s964_s21 + $0x190] sm:$0xff] %v347_v39  ;;  %476 = vst [vmem:[%s964_s21 + $0x198] sm:$0xff] %v348_v43  ;;  %v377_v36 = vmul.f32 %v943_v6, %v248_v33  ;;  %v250_v38 = vld [vmem:[%s931_s6 + $0x290] sm:$0xff]  ;;  %v251_v39 = vld [vmem:[%s931_s6 + $0x298] sm:$0xff]  ;;  %v378_v40 = vmul.f32 %v943_v6, %v249_v37 }
  0x5c   : > { %477 = vst [vmem:[%s964_s21 + $0x1a0] sm:$0xff] %v349_v44  ;;  %478 = vst [vmem:[%s964_s21 + $0x1a8] sm:$0xff] %v350_v45  ;;  %v379_v41 = vmul.f32 %v943_v6, %v250_v38  ;;  %v380_v42 = vmul.f32 %v943_v6, %v251_v39  ;;  %v252_v43 = vld [vmem:[%s931_s6 + $0x2a0] sm:$0xff]  ;;  %v253_v44 = vld [vmem:[%s931_s6 + $0x2a8] sm:$0xff] }
  0x5d   : > { %479 = vst [vmem:[%s964_s21 + $0x1b0] sm:$0xff] %v351_v49  ;;  %480 = vst [vmem:[%s964_s21 + $0x1b8] sm:$0xff] %v352_v50  ;;  %v254_v45 = vld [vmem:[%s931_s6 + $0x2b0] sm:$0xff]  ;;  %v381_v46 = vmul.f32 %v943_v6, %v252_v43  ;;  %v382_v47 = vmul.f32 %v943_v6, %v253_v44  ;;  %v255_v49 = vld [vmem:[%s931_s6 + $0x2b8] sm:$0xff] }
  0x5e   : > { %481 = vst [vmem:[%s964_s21 + $0x1c0] sm:$0xff] %v353_v51  ;;  %482 = vst [vmem:[%s964_s21 + $0x1c8] sm:$0xff] %v354_v55  ;;  %v383_v48 = vmul.f32 %v943_v6, %v254_v45  ;;  %v256_v50 = vld [vmem:[%s931_s6 + $0x2c0] sm:$0xff]  ;;  %v257_v51 = vld [vmem:[%s931_s6 + $0x2c8] sm:$0xff]  ;;  %v384_v52 = vmul.f32 %v943_v6, %v255_v49 }
  0x5f   : > { %483 = vst [vmem:[%s964_s21 + $0x1d0] sm:$0xff] %v355_v56  ;;  %484 = vst [vmem:[%s964_s21 + $0x1d8] sm:$0xff] %v356_v57  ;;  %v385_v53 = vmul.f32 %v943_v6, %v256_v50  ;;  %v386_v54 = vmul.f32 %v943_v6, %v257_v51  ;;  %v258_v55 = vld [vmem:[%s931_s6 + $0x2d0] sm:$0xff]  ;;  %v259_v56 = vld [vmem:[%s931_s6 + $0x2d8] sm:$0xff] }
  0x60   : > { %485 = vst [vmem:[%s964_s21 + $0x1e0] sm:$0xff] %v357_v61  ;;  %486 = vst [vmem:[%s964_s21 + $0x1e8] sm:$0xff] %v358_v62  ;;  %v260_v57 = vld [vmem:[%s931_s6 + $0x2e0] sm:$0xff]  ;;  %v387_v58 = vmul.f32 %v943_v6, %v258_v55  ;;  %v388_v59 = vmul.f32 %v943_v6, %v259_v56  ;;  %v261_v61 = vld [vmem:[%s931_s6 + $0x2e8] sm:$0xff] }
  0x61   : > { %487 = vst [vmem:[%s964_s21 + $0x1f0] sm:$0xff] %v359_v63  ;;  %488 = vst [vmem:[%s964_s21 + $0x1f8] sm:$0xff] %v360_v3  ;;  %v389_v60 = vmul.f32 %v943_v6, %v260_v57  ;;  %v262_v62 = vld [vmem:[%s931_s6 + $0x2f0] sm:$0xff]  ;;  %v263_v63 = vld [vmem:[%s931_s6 + $0x2f8] sm:$0xff]  ;;  %v390_v0 = vmul.f32 %v943_v6, %v261_v61 }
  0x62   : > { %489 = vst [vmem:[%s964_s21 + $0x200] sm:$0xff] %v361_v4  ;;  %490 = vst [vmem:[%s964_s21 + $0x208] sm:$0xff] %v362_v5  ;;  %v391_v1 = vmul.f32 %v943_v6, %v262_v62  ;;  %v392_v2 = vmul.f32 %v943_v6, %v263_v63  ;;  %v264_v3 = vld [vmem:[%s931_s6 + $0x300] sm:$0xff]  ;;  %v265_v4 = vld [vmem:[%s931_s6 + $0x308] sm:$0xff] }
  0x63   : > { %491 = vst [vmem:[%s964_s21 + $0x210] sm:$0xff] %v363_v10  ;;  %492 = vst [vmem:[%s964_s21 + $0x218] sm:$0xff] %v364_v11  ;;  %v266_v5 = vld [vmem:[%s931_s6 + $0x310] sm:$0xff]  ;;  %v393_v7 = vmul.f32 %v943_v6, %v264_v3  ;;  %v394_v8 = vmul.f32 %v943_v6, %v265_v4  ;;  %v267_v10 = vld [vmem:[%s931_s6 + $0x318] sm:$0xff] }
  0x64   : > { %493 = vst [vmem:[%s964_s21 + $0x220] sm:$0xff] %v365_v12  ;;  %494 = vst [vmem:[%s964_s21 + $0x228] sm:$0xff] %v366_v16  ;;  %v395_v9 = vmul.f32 %v943_v6, %v266_v5  ;;  %v268_v11 = vld [vmem:[%s931_s6 + $0x320] sm:$0xff]  ;;  %v269_v12 = vld [vmem:[%s931_s6 + $0x328] sm:$0xff]  ;;  %v396_v13 = vmul.f32 %v943_v6, %v267_v10 }
  0x65   : > { %495 = vst [vmem:[%s964_s21 + $0x230] sm:$0xff] %v367_v17  ;;  %496 = vst [vmem:[%s964_s21 + $0x238] sm:$0xff] %v368_v18  ;;  %v397_v14 = vmul.f32 %v943_v6, %v268_v11  ;;  %v398_v15 = vmul.f32 %v943_v6, %v269_v12  ;;  %v270_v16 = vld [vmem:[%s931_s6 + $0x330] sm:$0xff]  ;;  %v271_v17 = vld [vmem:[%s931_s6 + $0x338] sm:$0xff] }
  0x66   : > { %497 = vst [vmem:[%s964_s21 + $0x240] sm:$0xff] %v369_v22  ;;  %498 = vst [vmem:[%s964_s21 + $0x248] sm:$0xff] %v370_v23  ;;  %v272_v18 = vld [vmem:[%s931_s6 + $0x340] sm:$0xff]  ;;  %v399_v19 = vmul.f32 %v943_v6, %v270_v16  ;;  %v400_v20 = vmul.f32 %v943_v6, %v271_v17  ;;  %v273_v22 = vld [vmem:[%s931_s6 + $0x348] sm:$0xff] }
  0x67   : > { %499 = vst [vmem:[%s964_s21 + $0x250] sm:$0xff] %v371_v24  ;;  %500 = vst [vmem:[%s964_s21 + $0x258] sm:$0xff] %v372_v28  ;;  %v401_v21 = vmul.f32 %v943_v6, %v272_v18  ;;  %v274_v23 = vld [vmem:[%s931_s6 + $0x350] sm:$0xff]  ;;  %v275_v24 = vld [vmem:[%s931_s6 + $0x358] sm:$0xff]  ;;  %v402_v25 = vmul.f32 %v943_v6, %v273_v22 }
  0x68   : > { %501 = vst [vmem:[%s964_s21 + $0x260] sm:$0xff] %v373_v29  ;;  %502 = vst [vmem:[%s964_s21 + $0x268] sm:$0xff] %v374_v30  ;;  %v403_v26 = vmul.f32 %v943_v6, %v274_v23  ;;  %v404_v27 = vmul.f32 %v943_v6, %v275_v24  ;;  %v276_v28 = vld [vmem:[%s931_s6 + $0x360] sm:$0xff]  ;;  %v277_v29 = vld [vmem:[%s931_s6 + $0x368] sm:$0xff] }
  0x69   : > { %503 = vst [vmem:[%s964_s21 + $0x270] sm:$0xff] %v375_v34  ;;  %504 = vst [vmem:[%s964_s21 + $0x278] sm:$0xff] %v376_v35  ;;  %v278_v30 = vld [vmem:[%s931_s6 + $0x370] sm:$0xff]  ;;  %v405_v31 = vmul.f32 %v943_v6, %v276_v28  ;;  %v406_v32 = vmul.f32 %v943_v6, %v277_v29  ;;  %v279_v34 = vld [vmem:[%s931_s6 + $0x378] sm:$0xff] }
  0x6a   : > { %505 = vst [vmem:[%s964_s21 + $0x280] sm:$0xff] %v377_v36  ;;  %506 = vst [vmem:[%s964_s21 + $0x288] sm:$0xff] %v378_v40  ;;  %v407_v33 = vmul.f32 %v943_v6, %v278_v30  ;;  %v280_v35 = vld [vmem:[%s931_s6 + $0x380] sm:$0xff]  ;;  %v281_v36 = vld [vmem:[%s931_s6 + $0x388] sm:$0xff]  ;;  %v408_v37 = vmul.f32 %v943_v6, %v279_v34 }
  0x6b   : > { %507 = vst [vmem:[%s964_s21 + $0x290] sm:$0xff] %v379_v41  ;;  %508 = vst [vmem:[%s964_s21 + $0x298] sm:$0xff] %v380_v42  ;;  %v409_v38 = vmul.f32 %v943_v6, %v280_v35  ;;  %v410_v39 = vmul.f32 %v943_v6, %v281_v36  ;;  %v282_v40 = vld [vmem:[%s931_s6 + $0x390] sm:$0xff]  ;;  %v283_v41 = vld [vmem:[%s931_s6 + $0x398] sm:$0xff] }
  0x6c   : > { %509 = vst [vmem:[%s964_s21 + $0x2a0] sm:$0xff] %v381_v46  ;;  %510 = vst [vmem:[%s964_s21 + $0x2a8] sm:$0xff] %v382_v47  ;;  %v284_v42 = vld [vmem:[%s931_s6 + $0x3a0] sm:$0xff]  ;;  %v411_v43 = vmul.f32 %v943_v6, %v282_v40  ;;  %v412_v44 = vmul.f32 %v943_v6, %v283_v41  ;;  %v285_v46 = vld [vmem:[%s931_s6 + $0x3a8] sm:$0xff] }
  0x6d   : > { %511 = vst [vmem:[%s964_s21 + $0x2b0] sm:$0xff] %v383_v48  ;;  %512 = vst [vmem:[%s964_s21 + $0x2b8] sm:$0xff] %v384_v52  ;;  %v413_v45 = vmul.f32 %v943_v6, %v284_v42  ;;  %v286_v47 = vld [vmem:[%s931_s6 + $0x3b0] sm:$0xff]  ;;  %v287_v48 = vld [vmem:[%s931_s6 + $0x3b8] sm:$0xff]  ;;  %v414_v49 = vmul.f32 %v943_v6, %v285_v46 }
  0x6e   : > { %513 = vst [vmem:[%s964_s21 + $0x2c0] sm:$0xff] %v385_v53  ;;  %514 = vst [vmem:[%s964_s21 + $0x2c8] sm:$0xff] %v386_v54  ;;  %v415_v50 = vmul.f32 %v943_v6, %v286_v47  ;;  %v416_v51 = vmul.f32 %v943_v6, %v287_v48  ;;  %v288_v52 = vld [vmem:[%s931_s6 + $0x3c0] sm:$0xff]  ;;  %v289_v53 = vld [vmem:[%s931_s6 + $0x3c8] sm:$0xff] }
  0x6f   : > { %515 = vst [vmem:[%s964_s21 + $0x2d0] sm:$0xff] %v387_v58  ;;  %516 = vst [vmem:[%s964_s21 + $0x2d8] sm:$0xff] %v388_v59  ;;  %v290_v54 = vld [vmem:[%s931_s6 + $0x3d0] sm:$0xff]  ;;  %v417_v55 = vmul.f32 %v943_v6, %v288_v52  ;;  %v418_v56 = vmul.f32 %v943_v6, %v289_v53  ;;  %v291_v58 = vld [vmem:[%s931_s6 + $0x3d8] sm:$0xff] }
  0x70   : > { %517 = vst [vmem:[%s964_s21 + $0x2e0] sm:$0xff] %v389_v60  ;;  %518 = vst [vmem:[%s964_s21 + $0x2e8] sm:$0xff] %v390_v0  ;;  %v419_v57 = vmul.f32 %v943_v6, %v290_v54  ;;  %v292_v59 = vld [vmem:[%s931_s6 + $0x3e0] sm:$0xff]  ;;  %v293_v60 = vld [vmem:[%s931_s6 + $0x3e8] sm:$0xff]  ;;  %v420_v61 = vmul.f32 %v943_v6, %v291_v58 }
  0x71   : > { %519 = vst [vmem:[%s964_s21 + $0x2f0] sm:$0xff] %v391_v1  ;;  %520 = vst [vmem:[%s964_s21 + $0x2f8] sm:$0xff] %v392_v2  ;;  %v421_v62 = vmul.f32 %v943_v6, %v292_v59  ;;  %v422_v63 = vmul.f32 %v943_v6, %v293_v60  ;;  %v294_v0 = vld [vmem:[%s931_s6 + $0x3f0] sm:$0xff]  ;;  %v295_v1 = vld [vmem:[%s931_s6 + $0x3f8] sm:$0xff] }
  0x72   : > { %521 = vst [vmem:[%s964_s21 + $0x300] sm:$0xff] %v393_v7  ;;  %522 = vst [vmem:[%s964_s21 + $0x308] sm:$0xff] %v394_v8  ;;  %v423_v2 = vmul.f32 %v943_v6, %v294_v0  ;;  %v424_v3 = vmul.f32 %v943_v6, %v295_v1 }
  0x73   : > { %523 = vst [vmem:[%s964_s21 + $0x310] sm:$0xff] %v395_v9  ;;  %524 = vst [vmem:[%s964_s21 + $0x318] sm:$0xff] %v396_v13 }
  0x74   : > { %525 = vst [vmem:[%s964_s21 + $0x320] sm:$0xff] %v397_v14  ;;  %526 = vst [vmem:[%s964_s21 + $0x328] sm:$0xff] %v398_v15 }
  0x75   : > { %527 = vst [vmem:[%s964_s21 + $0x330] sm:$0xff] %v399_v19  ;;  %528 = vst [vmem:[%s964_s21 + $0x338] sm:$0xff] %v400_v20 }
  0x76   : > { %529 = vst [vmem:[%s964_s21 + $0x340] sm:$0xff] %v401_v21  ;;  %530 = vst [vmem:[%s964_s21 + $0x348] sm:$0xff] %v402_v25 }
  0x77   : > { %531 = vst [vmem:[%s964_s21 + $0x350] sm:$0xff] %v403_v26  ;;  %532 = vst [vmem:[%s964_s21 + $0x358] sm:$0xff] %v404_v27 }
  0x78   : > { %533 = vst [vmem:[%s964_s21 + $0x360] sm:$0xff] %v405_v31  ;;  %534 = vst [vmem:[%s964_s21 + $0x368] sm:$0xff] %v406_v32 }
  0x79   : > { %535 = vst [vmem:[%s964_s21 + $0x370] sm:$0xff] %v407_v33  ;;  %536 = vst [vmem:[%s964_s21 + $0x378] sm:$0xff] %v408_v37 }
  0x7a   : > { %537 = vst [vmem:[%s964_s21 + $0x380] sm:$0xff] %v409_v38  ;;  %538 = vst [vmem:[%s964_s21 + $0x388] sm:$0xff] %v410_v39 }
  0x7b   : > { %539 = vst [vmem:[%s964_s21 + $0x390] sm:$0xff] %v411_v43  ;;  %540 = vst [vmem:[%s964_s21 + $0x398] sm:$0xff] %v412_v44 }
  0x7c   : > { %541 = vst [vmem:[%s964_s21 + $0x3a0] sm:$0xff] %v413_v45  ;;  %542 = vst [vmem:[%s964_s21 + $0x3a8] sm:$0xff] %v414_v49 }
  0x7d   : > { %543 = vst [vmem:[%s964_s21 + $0x3b0] sm:$0xff] %v415_v50  ;;  %544 = vst [vmem:[%s964_s21 + $0x3b8] sm:$0xff] %v416_v51 }
  0x7e   : > { %545 = vst [vmem:[%s964_s21 + $0x3c0] sm:$0xff] %v417_v55  ;;  %546 = vst [vmem:[%s964_s21 + $0x3c8] sm:$0xff] %v418_v56 }
  0x7f   : > { %547 = vst [vmem:[%s964_s21 + $0x3d0] sm:$0xff] %v419_v57  ;;  %548 = vst [vmem:[%s964_s21 + $0x3d8] sm:$0xff] %v420_v61 }
  0x80   : > { %549 = vst [vmem:[%s964_s21 + $0x3e0] sm:$0xff] %v421_v62  ;;  %550 = vst [vmem:[%s964_s21 + $0x3e8] sm:$0xff] %v422_v63 }
  0x81   : > { %551 = vst [vmem:[%s964_s21 + $0x3f0] sm:$0xff] %v423_v2  ;;  %552 = vst [vmem:[%s964_s21 + $0x3f8] sm:$0xff] %v424_v3 }
  0x82   : > { %752 = shalt.err (!%p749_p9)
}
  0x83   : > { %s753_s20 = scalar_lea.hbm %s1322_s8, 16384  ;;  %s757_s26 = scalar_lea.hbm %s1378_s2, 131072 }
  0x84   : > { %p754_p13 = scmp.ne.s32.totalorder %s1322_s8, %s753_s20  ;;  %p758_p2 = scmp.lt.s32.totalorder %s1322_s8, %s1378_s2 }
  0x85   : > { %p759_p3 = scmp.lt.s32.totalorder %s757_s26, %s753_s20 }
  0x86   : > { %p755_p1 = pnand %p754_p13, %p1387_p11 }
  0x87   : > { %p760_p6 = por %p759_p3, %p758_p2 }
  0x88   : > { %p756_p0 = pneg %p755_p1 }
  0x8a   : > { %p761_p10 = pnand %p760_p6, %p756_p0 }
  0x8c   : > { %764 = shalt.err (!%p761_p10)
}
  0x8d   : > { %s809_s6 = smov 2048   ;;  %s810_s29 = smov 128  }
  0x8e   : > { %663 = dma.vmem_to_hbm [thread:$0]  (%p1387_p11), %s1324_s5, 16384, %s1322_s8, %s554_s9, %s809_s6, %s809_s6, %s810_s29  }
  0x8f PF: > { %p674_p12 = scmp.ge.s32.totalorder %s803_s14, 2  ;;  %s583_s3 = sand.u32 1, %s791_s11  }
  0x90   : > { %p1388_p4 = scmp.ne.s32.totalorder %s1384_s23, 0  ;;  %s584_s21 = scalar_lea.sflag [#allocation5], %s583_s3 }
  0x92   : > { %p670_p5 = pnand %p674_p12, %p1388_p4 }
  0x94   : > { %p671_p7 = pneg %p670_p5 }
  0x96   : > { %786 = dma.done.wait (%p671_p7), %s584_s21, 16384  }
  0x97   : > { %788 = vsyncadd (%p671_p7), %s584_s21, 4294950912  ;;  %p16_p8 = scmp.ge.s32.totalorder %s854_s16, 10   ;;  %s1389_s11 = smov %s795_s12 }
  0x98   : > { %s1390_s12 = smov %s799_s13  ;;  %s1391_s13 = smov %s866_s19 }
  0x99   : > { %s1392_s14 = smov %s854_s16  ;;  %18 = sbr.rel (!%p16_p8) target bundleno = 7 (0x7), region = 73 }
  0x9e   :  { %589 = vsyncpa [#allocation4], 1 }
  0x9f   :  { %591 = vsyncpa [#allocation4 + $0x1], 1 }
  0xa0   :  { %592 = vsyncpa [#allocation5], 1 }
  0xa1   :  { %594 = vsyncpa [#allocation5 + $0x1], 1 }

</bundles_post_ra>
